<compile_context>
chip_gen: v7x
topology: tpu7x:2x2x1
jax: 0.10.0
libtpu: 0.0.40
codegen_flags: <defaults>
</compile_context>

<pallas_src>
import functools

import jax
import jax.numpy as jnp
from jax.experimental import pallas as pl
from jax.experimental.pallas import tpu as pltpu

EPS = 1e-5
_TARGET_GRID_STEPS = 4               # keep >= this many steps so DMA pipelines
_DEFAULT_VMEM_LIMIT = 32 * 1024 * 1024


# ---------------------------------------------------------------------------
# Small helpers
# ---------------------------------------------------------------------------
def _round_up(x, m):
    return ((x + m - 1) // m) * m


def _round_down(x, m):
    return max(m, (x // m) * m)


def _sublane(dtype):
    """Sublane packing multiple: 8 for f32, 16 for bf16, 32 for int8/fp8."""
    itemsize = jnp.dtype(dtype).itemsize
    return max(8, 8 * (4 // max(1, itemsize)))


@functools.lru_cache(maxsize=1)
def _vmem_limit_bytes():
    """Per-chip scoped-VMEM request: big on v5e/v6e (128 MiB physical),
    conservative on v7x (64 MiB physical) or when detection fails."""
    try:
        cap = getattr(pltpu.get_tpu_info(), "vmem_capacity_bytes", None)
    except Exception:
        cap = None
    if cap is not None and cap >= 128 * 1024 * 1024:
        return 64 * 1024 * 1024       # v5e / v6e
    return _DEFAULT_VMEM_LIMIT        # v7x / unknown: stay temp-aware & safe


def _choose_tiles(rows, hw, dtype):
    """Return (tm, thw).  thw is None for the fused single-pass path."""
    itemsize = jnp.dtype(dtype).itemsize
    sub = _sublane(dtype)
    # ~2/3 of the scoped limit for pipeline buffers + in-kernel temporaries.
    budget = (_vmem_limit_bytes() * 2) // 3

    # Fused path footprint per row of a (tm, HW) block:
    #   2x input + 2x output (double-buffered)     -> 4*HW*itemsize
    #   in-kernel f32 temporaries (x_f32, xc)      -> 2*HW*4
    #   (tm, 2) gamma/beta blocks live in full (8,128) lane tiles in VMEM,
    #   i.e. 512 B/row per buffer, double-buffered -> 1024 B
    #   (lane-major (2, rows) gb layout only pays off at multi-thousand tm;
    #    the budget already charges for the padded layout.)
    per_row = 4 * hw * itemsize + 2 * hw * 4 + 2 * 512
    tm_budget = budget // per_row
    if tm_budget >= sub:
        # Let the byte budget set the tile; only cap it so the grid still has
        # ~_TARGET_GRID_STEPS steps for the pipeliner to overlap DMA/compute.
        tm_target = _round_up(pl.cdiv(rows, _TARGET_GRID_STEPS), sub)
        tm = max(sub, min(_round_down(tm_budget, sub), tm_target))
        return tm, None

    # Large-HW fallback (hits earliest on v7x's 64 MiB VMEM): two-pass
    # HW-split reduction with sublane-high row blocks and wide lane chunks.
    tm = sub
    per_col = tm * (4 * itemsize + 4)       # 2x in + 2x out + f32 temp
    thw = _round_down(budget // per_col, 128)
    thw = min(thw, _round_up(hw, 128))
    return tm, thw


# ---------------------------------------------------------------------------
# Fused path: instance-norm + class-conditional affine on full (tm, HW) rows
# ---------------------------------------------------------------------------
def _cin_kernel(x_ref, gb_ref, o_ref):
    # x_ref: (tm, HW)  -- each row is one (batch, channel) instance
    # gb_ref: (tm, 2)  -- column 0 = gamma, column 1 = beta (f32)
    x = x_ref[...].astype(jnp.float32)
    gb = gb_ref[...]
    gamma = gb[:, 0:1]                                     # (tm, 1)
    beta = gb[:, 1:2]                                      # (tm, 1)

    mean = jnp.mean(x, axis=-1, keepdims=True)             # lane reduce (XLU)
    xc = x - mean
    var = jnp.mean(xc * xc, axis=-1, keepdims=True)        # biased variance
    scale = gamma * jax.lax.rsqrt(var + EPS)
    o_ref[...] = (xc * scale + beta).astype(o_ref.dtype)


def _cin_fused(x_flat, gb, tm):
    rows, hw = x_flat.shape
    itemsize = jnp.dtype(x_flat.dtype).itemsize
    n_r = pl.cdiv(rows, tm)                 # ragged tail handled by Pallas;
                                            # no HBM pad / slice copies.
    cost = pl.CostEstimate(
        flops=8 * rows * hw,
        transcendentals=rows,
        bytes_accessed=2 * rows * hw * itemsize + rows * 2 * 4,
    )
    return pl.pallas_call(
        _cin_kernel,
        out_shape=jax.ShapeDtypeStruct((rows, hw), x_flat.dtype),
        grid=(n_r,),
        in_specs=[
            pl.BlockSpec((tm, hw), lambda r: (r, 0)),
            pl.BlockSpec((tm, 2), lambda r: (r, 0)),
        ],
        out_specs=pl.BlockSpec((tm, hw), lambda r: (r, 0)),
        compiler_params=pltpu.CompilerParams(
            # TODO(synk): on v7x try dimension_semantics=(pltpu.CORE_PARALLEL,)
            # to shard the row axis across both TensorCores (kept "parallel"
            # here so the kernel lowers cleanly on every generation).
            dimension_semantics=("parallel",),
            vmem_limit_bytes=_vmem_limit_bytes(),
        ),
        cost_estimate=cost,
    )(x_flat, gb)


# ---------------------------------------------------------------------------
# Large-HW path: two-pass HW-split reduction + fused apply
# ---------------------------------------------------------------------------
def _stats_kernel(x_ref, s_ref, *, hw_total):
    # x_ref: (tm, thw) chunk; s_ref: (tm, 2) resident accumulator [sum, sumsq]
    h = pl.program_id(1)
    thw = x_ref.shape[-1]
    x = x_ref[...].astype(jnp.float32)
    # Mask the ragged lane tail of the last HW chunk so garbage columns
    # never pollute the running sums.
    col = jax.lax.broadcasted_iota(jnp.int32, x.shape, 1) + h * thw
    x = jnp.where(col < hw_total, x, 0.0)

    s = jnp.sum(x, axis=-1, keepdims=True)                 # (tm, 1)
    ss = jnp.sum(x * x, axis=-1, keepdims=True)            # (tm, 1)
    part = jnp.concatenate([s, ss], axis=-1)               # (tm, 2)

    @pl.when(h == 0)
    def _():
        s_ref[...] = jnp.zeros_like(s_ref)

    s_ref[...] += part


def _apply_kernel(x_ref, p_ref, o_ref):
    # p_ref: (tm, 2) -- column 0 = scale, column 1 = shift (f32)
    p = p_ref[...]
    x = x_ref[...].astype(jnp.float32)
    o_ref[...] = (x * p[:, 0:1] + p[:, 1:2]).astype(o_ref.dtype)


def _cin_hw_split(x_flat, gb, tm, thw):
    rows, hw = x_flat.shape
    n_r = pl.cdiv(rows, tm)
    n_h = pl.cdiv(hw, thw)
    vmem_limit = _vmem_limit_bytes()

    stats = pl.pallas_call(
        functools.partial(_stats_kernel, hw_total=hw),
        out_shape=jax.ShapeDtypeStruct((rows, 2), jnp.float32),
        grid=(n_r, n_h),                                   # reduction axis last
        in_specs=[pl.BlockSpec((tm, thw), lambda r, h: (r, h))],
        out_specs=pl.BlockSpec((tm, 2), lambda r, h: (r, 0)),
        compiler_params=pltpu.CompilerParams(
            dimension_semantics=("parallel", "arbitrary"),
            vmem_limit_bytes=vmem_limit,
        ),
    )(x_flat)

    # Tiny per-row math in plain jnp: fold the affine into scale/shift.
    mean = stats[:, 0] / hw
    var = jnp.maximum(stats[:, 1] / hw - mean * mean, 0.0)  # biased variance
    scale = gb[:, 0] * jax.lax.rsqrt(var + EPS)
    shift = gb[:, 1] - mean * scale
    ps = jnp.stack([scale, shift], axis=-1)                 # (rows, 2) f32

    return pl.pallas_call(
        _apply_kernel,
        out_shape=jax.ShapeDtypeStruct((rows, hw), x_flat.dtype),
        grid=(n_r, n_h),
        in_specs=[
            pl.BlockSpec((tm, thw), lambda r, h: (r, h)),
            pl.BlockSpec((tm, 2), lambda r, h: (r, 0)),
        ],
        out_specs=pl.BlockSpec((tm, thw), lambda r, h: (r, h)),
        compiler_params=pltpu.CompilerParams(
            dimension_semantics=("parallel", "parallel"),
            vmem_limit_bytes=vmem_limit,
        ),
    )(x_flat, ps)


# ---------------------------------------------------------------------------
# Public wrapper
# ---------------------------------------------------------------------------
def class_conditional_instance_norm(x, gamma, beta):
    """x: (B, C, H, W); gamma, beta: (B, C).  Returns (B, C, H, W)."""
    B, C, H, W = x.shape
    rows, hw = B * C, H * W

    x_flat = x.reshape(rows, hw)
    # Pack gamma/beta into one small side input: one DMA per grid step.
    gb = jnp.stack([gamma.reshape(rows), beta.reshape(rows)], axis=-1)
    gb = gb.astype(jnp.float32)

    tm, thw = _choose_tiles(rows, hw, x.dtype)
    if thw is None:
        out_flat = _cin_fused(x_flat, gb, tm)
    else:
        out_flat = _cin_hw_split(x_flat, gb, tm, thw)
    return out_flat.reshape(B, C, H, W)


# ---------------------------------------------------------------------------
# Parameter construction (deterministic, mirrors the PyTorch __init__)
# ---------------------------------------------------------------------------
def init_params(key, num_features, num_classes):
    F2 = num_features * 2
    k_emb, k_w1, k_w2 = jax.random.split(key, 3)

    # nn.Embedding(num_classes, 2C): first C cols ~ N(1, 0.02), last C cols = 0
    embed_w = jnp.concatenate(
        [1.0 + 0.02 * jax.random.normal(k_emb, (num_classes, num_features)),
         jnp.zeros((num_classes, num_features))], axis=1).astype(jnp.float32)

    # nn.Linear(2C, 2C) x2, xavier_uniform weights, bias = 0.1
    bound = (6.0 / (F2 + F2)) ** 0.5
    w1 = jax.random.uniform(k_w1, (F2, F2), minval=-bound, maxval=bound,
                            dtype=jnp.float32)   # PyTorch shape (out, in)
    w2 = jax.random.uniform(k_w2, (F2, F2), minval=-bound, maxval=bound,
                            dtype=jnp.float32)
    b1 = jnp.full((F2,), 0.1, dtype=jnp.float32)
    b2 = jnp.full((F2,), 0.1, dtype=jnp.float32)
    # Pre-transpose once (PyTorch Linear computes x @ W.T + b).
    return dict(embed_w=embed_w, w1_t=w1.T, b1=b1, w2_t=w2.T, b2=b2)


@functools.partial(jax.jit, static_argnames=("cin_affine",))
def forward(params, x, y, cin_affine=True):
    B, C, H, W = x.shape
    if cin_affine:
        # Tiny (B,2C)x(2C,2C) MLP: plain jnp so XLA fuses it with the
        # embedding gather; a Pallas call here would be pure launch overhead.
        emb = params["embed_w"][y]                                   # (B, 2C)
        h = jnp.maximum(emb @ params["w1_t"] + params["b1"], 0.0)    # ReLU
        gb = h @ params["w2_t"] + params["b2"]                       # (B, 2C)
        gamma, beta = gb[:, :C], gb[:, C:]
    else:
        gamma = jnp.ones((B, C), jnp.float32)
        beta = jnp.zeros((B, C), jnp.float32)
    return class_conditional_instance_norm(x, gamma, beta)


# ---------------------------------------------------------------------------
def _reference(params, x, y):
    """Pure-JAX reference for sanity checking."""
    B, C, H, W = x.shape
    mean = x.mean(axis=(2, 3), keepdims=True)
    var = x.var(axis=(2, 3), keepdims=True)
    xn = (x - mean) / jnp.sqrt(var + EPS)
    emb = params["embed_w"][y]
    h = jnp.maximum(emb @ params["w1_t"] + params["b1"], 0.0)
    gb = h @ params["w2_t"] + params["b2"]
    gamma, beta = gb[:, :C], gb[:, C:]
    return gamma[:, :, None, None] * xn + beta[:, :, None, None]


if __name__ == "__main__":
    B, C, H, W = 2, 4, 16, 16
    num_classes = 10

    key = jax.random.PRNGKey(0)
    k_params, k_x, k_y, k_x2, k_g2, k_b2 = jax.random.split(key, 6)

    params = init_params(k_params, num_features=C, num_classes=num_classes)
    x = jax.random.normal(k_x, (B, C, H, W), dtype=jnp.float32)
    y = jax.random.randint(k_y, (B,), 0, num_classes)

    out = jax.block_until_ready(forward(params, x, y))
    ref = _reference(params, x, y)
    assert out.shape == (B, C, H, W)
    assert jnp.allclose(out, ref, atol=1e-4, rtol=1e-4), "fused path mismatch"

    # Also validate the large-HW (two-pass HW-split) fallback at a small shape
    # with a ragged HW chunk (HW=360 is not a multiple of 128).
    B2, C2, H2, W2 = 2, 4, 18, 20
    x2 = jax.random.normal(k_x2, (B2, C2, H2, W2), dtype=jnp.float32)
    g2 = 1.0 + 0.1 * jax.random.normal(k_g2, (B2, C2))
    b2 = 0.1 * jax.random.normal(k_b2, (B2, C2))
    gb2 = jnp.stack([g2.reshape(-1), b2.reshape(-1)], axis=-1).astype(jnp.float32)
    out2 = _cin_hw_split(x2.reshape(B2 * C2, H2 * W2), gb2, tm=8, thw=128)
    out2 = jax.block_until_ready(out2).reshape(B2, C2, H2, W2)
    m2 = x2.mean(axis=(2, 3), keepdims=True)
    v2 = x2.var(axis=(2, 3), keepdims=True)
    ref2 = (g2[:, :, None, None] * (x2 - m2) / jnp.sqrt(v2 + EPS)
            + b2[:, :, None, None])
    assert jnp.allclose(out2, ref2, atol=1e-4, rtol=1e-4), "hw-split mismatch"

    print("KERNEL_OK")
</pallas_src>

<mosaic_0001>
module attributes {stable_mosaic.version = 11 : i64} {
  func.func @_cin_kernel(%arg0: i32, %arg1: memref<8x256xf32, #tpu.memory_space<vmem>>, %arg2: memref<8x2xf32, #tpu.memory_space<vmem>>, %arg3: memref<8x256xf32, #tpu.memory_space<vmem>>) attributes {dimension_semantics = [#tpu.dimension_semantics<parallel>], iteration_bounds = array<i64: 1>, scalar_prefetch = 0 : i64, scratch_operands = 0 : i64, tpu.core_type = #tpu.core_type<tc>, window_params = [{transform_indices = @transform_0, window_bounds = array<i64: 8, 256>}, {transform_indices = @transform_1, window_bounds = array<i64: 8, 2>}, {transform_indices = @transform_2, window_bounds = array<i64: 8, 256>}]} {
    %c0 = arith.constant 0 : index
    %c0_0 = arith.constant 0 : index
    %0 = vector.load %arg1[%c0, %c0_0] : memref<8x256xf32, #tpu.memory_space<vmem>>, vector<8x256xf32>
    %c0_1 = arith.constant 0 : index
    %c0_2 = arith.constant 0 : index
    %1 = vector.load %arg2[%c0_1, %c0_2] : memref<8x2xf32, #tpu.memory_space<vmem>>, vector<8x2xf32>
    %2 = vector.extract_strided_slice %1 {offsets = [0, 0], sizes = [8, 1], strides = [1, 1]} : vector<8x2xf32> to vector<8x1xf32>
    %3 = vector.extract_strided_slice %1 {offsets = [0, 1], sizes = [8, 1], strides = [1, 1]} : vector<8x2xf32> to vector<8x1xf32>
    %cst = arith.constant dense<0.000000e+00> : vector<8xf32>
    %4 = vector.multi_reduction <add>, %0, %cst [1] : vector<8x256xf32> to vector<8xf32>
    %5 = vector.shape_cast %4 : vector<8xf32> to vector<8x1xf32>
    %cst_3 = arith.constant 2.560000e+02 : f32
    %6 = vector.broadcast %cst_3 : f32 to vector<8x1xf32>
    %7 = arith.divf %5, %6 : vector<8x1xf32>
    %8 = vector.broadcast %7 : vector<8x1xf32> to vector<8x256xf32>
    %9 = arith.subf %0, %8 : vector<8x256xf32>
    %10 = arith.mulf %9, %9 : vector<8x256xf32>
    %cst_4 = arith.constant dense<0.000000e+00> : vector<8xf32>
    %11 = vector.multi_reduction <add>, %10, %cst_4 [1] : vector<8x256xf32> to vector<8xf32>
    %12 = vector.shape_cast %11 : vector<8xf32> to vector<8x1xf32>
    %cst_5 = arith.constant 2.560000e+02 : f32
    %13 = vector.broadcast %cst_5 : f32 to vector<8x1xf32>
    %14 = arith.divf %12, %13 : vector<8x1xf32>
    %cst_6 = arith.constant 9.99999974E-6 : f32
    %15 = vector.broadcast %cst_6 : f32 to vector<8x1xf32>
    %16 = arith.addf %14, %15 : vector<8x1xf32>
    %17 = math.rsqrt %16 : vector<8x1xf32>
    %18 = arith.mulf %2, %17 : vector<8x1xf32>
    %19 = vector.broadcast %18 : vector<8x1xf32> to vector<8x256xf32>
    %20 = arith.mulf %9, %19 : vector<8x256xf32>
    %21 = vector.broadcast %3 : vector<8x1xf32> to vector<8x256xf32>
    %22 = arith.addf %20, %21 : vector<8x256xf32>
    %c0_7 = arith.constant 0 : index
    %c0_8 = arith.constant 0 : index
    %23 = vector.load %arg3[%c0_7, %c0_8] : memref<8x256xf32, #tpu.memory_space<vmem>>, vector<8x256xf32>
    tpu.vector_store %arg3[%c0_7, %c0_8], %22 {strides = array<i32>} : memref<8x256xf32, #tpu.memory_space<vmem>>, vector<8x256xf32>,
    return
  }
  func.func @transform_0(%arg0: i32) -> (i32, i32) {
    %c0_i32 = arith.constant 0 : i32
    %c0_i32_0 = arith.constant 0 : i32
    return %arg0, %c0_i32 : i32, i32
  }
  func.func @transform_1(%arg0: i32) -> (i32, i32) {
    %c0_i32 = arith.constant 0 : i32
    %c0_i32_0 = arith.constant 0 : i32
    return %arg0, %c0_i32 : i32, i32
  }
  func.func @transform_2(%arg0: i32) -> (i32, i32) {
    %c0_i32 = arith.constant 0 : i32
    %c0_i32_0 = arith.constant 0 : i32
    return %arg0, %c0_i32 : i32, i32
  }
}

</mosaic_0001>

<bundles_post_ra>
// kernel: forward.1
= control target key start
LH: loop header
LB: loop body
LE: loop exit
PB: predicated region body
PF: predicated region fallthrough
CT: control target
= control target key end

     0   :  { %v57_v10 = vmov 0   ;;  %v58_v11 = vmov 1   ;;  %s89_s0 = inlined_call_operand.vmem [shape: f32[8,256], index: 0, kind: input, shape index: {}]   ;;  %s90_s1 = inlined_call_operand.vmem [shape: f32[8,2], index: 1, kind: input, shape index: {}]   ;;  %s91_s2 = inlined_call_operand.vmem [shape: f32[8,256], index: 2, kind: output, shape index: {}]  }
   0x1   :  { %v11_v0 = vld [vmem:[%s89_s0] sm:$0xff]  ;;  %v12_v1 = vld [vmem:[%s89_s0 + $0x8] sm:$0xff]  ;;  %52 = vset.pattern.permute.xlu1 %v57_v10  ;;  %54 = vset.pattern.permute.xlu0 %v58_v11 }
   0x2   :  { %v14_v2 = vadd.f32 %v12_v1, %v11_v0  ;;  %v13_v15 = vld [vmem:[%s90_s1] sm:$0xff] }
   0x4   :  { %15 = vadd.xlane.f32.xlu0 %v14_v2 }
  0x91   :  { %v16_v3 = vpop.xlane.xlu0 %15 }
  0x92   :  { %v18_v4 = vmul.f32 0.00390625, %v16_v3 }
  0x94   :  { %v19_v5 = vsub.f32 %v11_v0, %v18_v4  ;;  %v20_v6 = vsub.f32 %v12_v1, %v18_v4 }
  0x96   :  { %v21_v7 = vmul.f32 %v19_v5, %v19_v5  ;;  %v22_v8 = vmul.f32 %v20_v6, %v20_v6 }
  0x98   :  { %v23_v9 = vadd.f32 %v22_v8, %v21_v7 }
  0x9a   :  { %24 = vadd.xlane.f32.xlu0 %v23_v9 }
 0x127   :  { %v25_v12 = vpop.xlane.xlu0 %24 }
 0x128   :  { %v26_v13 = vmul.f32 0.00390625, %v25_v12 }
 0x12a   :  { %v27_v14 = vadd.f32 1e-05, %v26_v13 }
 0x12c   :  { %55 = vrsqrt.f32 %v27_v14 }
 0x136   :  { %v56_v16 = vpop.eup %55 }
 0x137   :  { %v29_v17 = vmul.f32 %v56_v16, %v13_v15 }
 0x139   :  { %32 = vperm.xlu1 %52, %v29_v17  }
 0x13d   :  { %53 = vset.pattern.permute.xlu1 %v58_v11 }
 0x13e   :  { %39 = vperm.xlu1 %53, %v13_v15  }
 0x1b8   :  { %v33_v18 = vpop.permute.xlu1 %32 }
 0x1b9   :  { %v35_v19 = vmul.f32 %v33_v18, %v19_v5  ;;  %v36_v20 = vmul.f32 %v33_v18, %v20_v6 }
 0x1bd   :  { %v40_v21 = vpop.permute.xlu1 %39 }
 0x1be   :  { %v42_v22 = vadd.f32 %v40_v21, %v35_v19  ;;  %v43_v23 = vadd.f32 %v40_v21, %v36_v20 }
 0x1c0   :  { %44 = vst [vmem:[%s91_s2] sm:$0xff] %v42_v22  ;;  %45 = vst [vmem:[%s91_s2 + $0x8] sm:$0xff] %v43_v23 }

</bundles_post_ra>
